<compile_context>
chip_gen: v7x
topology: tpu7x:2x2x1
jax: 0.10.0
libtpu: 0.0.40
codegen_flags: <defaults>
</compile_context>

<pallas_src>
import functools

import jax
import jax.numpy as jnp
from jax.experimental import pallas as pl
from jax.experimental.pallas import tpu as pltpu

_LANE = 128


def _round_up(x: int, m: int) -> int:
    return ((x + m - 1) // m) * m


def _solar_kernel(coefs_ref, rad_ref, direct_ref, wall_ref, roof_ref):
    """coefs_ref: (3,) SMEM scalars [dc, wc, rc]; rad/outs: [tm, 128] VMEM."""
    x = rad_ref[...]
    direct_ref[...] = coefs_ref[0] * x
    wall_ref[...] = coefs_ref[1] * x
    roof_ref[...] = coefs_ref[2] * x


@functools.partial(jax.jit, static_argnums=(3, 4, 5))
def solar_radiation_forward(radiation, params, env_coefs, n_wall, n_roof,
                            tile_rows=1024):
    """radiation: [B, T, D] float32; params/env_coefs: (3,) float32 each.

    Returns (direct_gain [B,T,D], wall_gains list of n_wall [B,T,1],
             roof_gains list of n_roof [B,T,D]) matching the PyTorch module.
    """
    B, T, D = radiation.shape
    radiation = radiation.astype(jnp.float32)

    # Stable softplus(param) * envelope coefficient, hoisted out of the kernel.
    coefs = jax.nn.softplus(params.astype(jnp.float32)) * env_coefs.astype(
        jnp.float32)  # (3,) -> [direct, wall, roof]

    # --- lane-dense layout: flatten, pad, view as [rows_padded, 128] ---------
    total = B * T * D
    rows = -(-total // _LANE)                       # ceil div
    tm = _round_up(min(tile_rows, _round_up(rows, 8)), 8)
    rows_padded = _round_up(rows, tm)
    padded = rows_padded * _LANE

    x_flat = radiation.reshape(-1)
    x_flat = jnp.pad(x_flat, (0, padded - total))
    x2d = x_flat.reshape(rows_padded, _LANE)

    grid = (rows_padded // tm,)
    # index_map receives the scalar-prefetch ref as trailing positional arg.
    blk = pl.BlockSpec((tm, _LANE), lambda i, coefs: (i, 0))

    out_shape = tuple(
        jax.ShapeDtypeStruct((rows_padded, _LANE), jnp.float32)
        for _ in range(3))

    grid_spec = pltpu.PrefetchScalarGridSpec(
        num_scalar_prefetch=1,          # coefs -> SMEM before the grid runs
        grid=grid,
        in_specs=[blk],
        out_specs=[blk, blk, blk],
    )

    direct2d, wall2d, roof2d = pl.pallas_call(
        _solar_kernel,
        out_shape=out_shape,
        grid_spec=grid_spec,
        compiler_params=pltpu.CompilerParams(
            dimension_semantics=("parallel",)),
    )(coefs, x2d)

    def unflatten(a):
        return a.reshape(-1)[:total].reshape(B, T, D)

    direct_gain = unflatten(direct2d)
    wall_full = unflatten(wall2d)      # wc * radiation, full [B, T, D]
    roof = unflatten(roof2d)

    if D > 1:
        wall_gains = []
        for i in range(n_wall):
            di = min(i, D - 1)
            wall_gains.append(wall_full[:, :, di:di + 1])
    else:
        wall_gains = [wall_full] * n_wall

    roof_gains = [roof] * n_roof
    return direct_gain, wall_gains, roof_gains


if __name__ == "__main__":
    key = jax.random.PRNGKey(0)

    # Small shapes consistent with the module: [batch, time, directions].
    B, T, D = 2, 8, 4          # E, S, W, N directions
    n_wall, n_roof = 4, 1

    radiation = jax.random.uniform(key, (B, T, D), dtype=jnp.float32) * 800.0

    # nn.Parameter inits from __init__ (all 0.1), deterministic.
    params = jnp.array([0.1, 0.1, 0.1], dtype=jnp.float32)
    # envelop dict coefficients (synthetic but deterministic).
    env_coefs = jnp.array([0.3, 0.5, 0.7], dtype=jnp.float32)

    direct_gain, wall_gains, roof_gains = solar_radiation_forward(
        radiation, params, env_coefs, n_wall, n_roof)
    jax.block_until_ready(direct_gain)
    jax.block_until_ready(wall_gains[-1])
    jax.block_until_ready(roof_gains[-1])

    # Pure-JAX reference check (same math as the PyTorch forward).
    dc = jax.nn.softplus(params[0]) * env_coefs[0]
    wc = jax.nn.softplus(params[1]) * env_coefs[1]
    rc = jax.nn.softplus(params[2]) * env_coefs[2]
    ref_direct = dc * radiation
    ref_walls = [wc * radiation[:, :, min(i, D - 1):min(i, D - 1) + 1]
                 for i in range(n_wall)]
    ref_roof = rc * radiation

    assert direct_gain.shape == ref_direct.shape
    assert jnp.allclose(direct_gain, ref_direct, atol=1e-5, rtol=1e-5)
    for got, ref in zip(wall_gains, ref_walls):
        assert got.shape == ref.shape
        assert jnp.allclose(got, ref, atol=1e-5, rtol=1e-5)
    for got in roof_gains:
        assert got.shape == ref_roof.shape
        assert jnp.allclose(got, ref_roof, atol=1e-5, rtol=1e-5)

    print("KERNEL_OK")
</pallas_src>

<mosaic_0001>
module attributes {stable_mosaic.version = 11 : i64} {
  func.func @_solar_kernel(%arg0: i32, %arg1: memref<3xf32, #tpu.memory_space<smem>>, %arg2: memref<8x128xf32, #tpu.memory_space<vmem>>, %arg3: memref<8x128xf32, #tpu.memory_space<vmem>>, %arg4: memref<8x128xf32, #tpu.memory_space<vmem>>, %arg5: memref<8x128xf32, #tpu.memory_space<vmem>>) attributes {dimension_semantics = [#tpu.dimension_semantics<parallel>], iteration_bounds = array<i64: 1>, scalar_prefetch = 1 : i64, scratch_operands = 0 : i64, tpu.core_type = #tpu.core_type<tc>, window_params = [{transform_indices = @transform_0, window_bounds = array<i64: 8, 128>}, {transform_indices = @transform_1, window_bounds = array<i64: 8, 128>}, {transform_indices = @transform_2, window_bounds = array<i64: 8, 128>}, {transform_indices = @transform_3, window_bounds = array<i64: 8, 128>}]} {
    %c0 = arith.constant 0 : index
    %c0_0 = arith.constant 0 : index
    %0 = vector.load %arg2[%c0, %c0_0] : memref<8x128xf32, #tpu.memory_space<vmem>>, vector<8x128xf32>
    %c0_1 = arith.constant 0 : index
    %1 = memref.load %arg1[%c0_1] : memref<3xf32, #tpu.memory_space<smem>>
    %2 = vector.broadcast %1 : f32 to vector<8x128xf32>
    %3 = arith.mulf %2, %0 : vector<8x128xf32>
    %c0_2 = arith.constant 0 : index
    %c0_3 = arith.constant 0 : index
    %4 = vector.load %arg3[%c0_2, %c0_3] : memref<8x128xf32, #tpu.memory_space<vmem>>, vector<8x128xf32>
    tpu.vector_store %arg3[%c0_2, %c0_3], %3 {strides = array<i32>} : memref<8x128xf32, #tpu.memory_space<vmem>>, vector<8x128xf32>,
    %c1 = arith.constant 1 : index
    %5 = memref.load %arg1[%c1] : memref<3xf32, #tpu.memory_space<smem>>
    %6 = vector.broadcast %5 : f32 to vector<8x128xf32>
    %7 = arith.mulf %6, %0 : vector<8x128xf32>
    %c0_4 = arith.constant 0 : index
    %c0_5 = arith.constant 0 : index
    %8 = vector.load %arg4[%c0_4, %c0_5] : memref<8x128xf32, #tpu.memory_space<vmem>>, vector<8x128xf32>
    tpu.vector_store %arg4[%c0_4, %c0_5], %7 {strides = array<i32>} : memref<8x128xf32, #tpu.memory_space<vmem>>, vector<8x128xf32>,
    %c2 = arith.constant 2 : index
    %9 = memref.load %arg1[%c2] : memref<3xf32, #tpu.memory_space<smem>>
    %10 = vector.broadcast %9 : f32 to vector<8x128xf32>
    %11 = arith.mulf %10, %0 : vector<8x128xf32>
    %c0_6 = arith.constant 0 : index
    %c0_7 = arith.constant 0 : index
    %12 = vector.load %arg5[%c0_6, %c0_7] : memref<8x128xf32, #tpu.memory_space<vmem>>, vector<8x128xf32>
    tpu.vector_store %arg5[%c0_6, %c0_7], %11 {strides = array<i32>} : memref<8x128xf32, #tpu.memory_space<vmem>>, vector<8x128xf32>,
    return
  }
  func.func @transform_0(%arg0: i32, %arg1: memref<3xf32, #tpu.memory_space<smem>>) -> (i32, i32) {
    %c0_i32 = arith.constant 0 : i32
    %c0_i32_0 = arith.constant 0 : i32
    return %arg0, %c0_i32 : i32, i32
  }
  func.func @transform_1(%arg0: i32, %arg1: memref<3xf32, #tpu.memory_space<smem>>) -> (i32, i32) {
    %c0_i32 = arith.constant 0 : i32
    %c0_i32_0 = arith.constant 0 : i32
    return %arg0, %c0_i32 : i32, i32
  }
  func.func @transform_2(%arg0: i32, %arg1: memref<3xf32, #tpu.memory_space<smem>>) -> (i32, i32) {
    %c0_i32 = arith.constant 0 : i32
    %c0_i32_0 = arith.constant 0 : i32
    return %arg0, %c0_i32 : i32, i32
  }
  func.func @transform_3(%arg0: i32, %arg1: memref<3xf32, #tpu.memory_space<smem>>) -> (i32, i32) {
    %c0_i32 = arith.constant 0 : i32
    %c0_i32_0 = arith.constant 0 : i32
    return %arg0, %c0_i32 : i32, i32
  }
}

</mosaic_0001>

<bundles_post_ra>
// kernel: solar_radiation_forward.1
= control target key start
LH: loop header
LB: loop body
LE: loop exit
PB: predicated region body
PF: predicated region fallthrough
CT: control target
= control target key end

     0   :  { %s101_s0 = inlined_call_operand.vmem [shape: f32[3], index: 0, kind: input, shape index: {}]   ;;  %s102_s1 = inlined_call_operand.vmem [shape: f32[8,128], index: 1, kind: input, shape index: {}]   ;;  %s103_s2 = inlined_call_operand.vmem [shape: f32[8,128], index: 2, kind: output, shape index: {0}]   ;;  %s104_s3 = inlined_call_operand.vmem [shape: f32[8,128], index: 3, kind: output, shape index: {1}]   ;;  %s105_s4 = inlined_call_operand.vmem [shape: f32[8,128], index: 4, kind: output, shape index: {2}]  }
   0x1   :  { %s10_s17 = sshll.u32 %s101_s0, 4  ;;  %s11_s17 = int_to_ptr.vmem [resolvable:$true] %s10_s17 }
   0x2   :  { %s46_s18 = scalar_lea.vmem %s11_s17, 16  ;;  %p51_p1 = scmp.lt.s32.totalorder %s11_s17, %s11_s17 }
   0x3   :  { %p47_p0 = scmp.ne.s32.totalorder %s11_s17, %s46_s18  ;;  %p52_p2 = scmp.lt.s32.totalorder %s46_s18, %s46_s18 }
   0x5   :  { %p53_p3 = por %p52_p2, %p51_p1 }
   0x7   :  { %p54_p4 = pnand %p53_p3, %p47_p0 }
   0x9   :  { %57 = shalt.err (!%p54_p4)  }
   0xa   :  { %s60_s19 = smov [#allocation3]  }
   0xb   :  { %13 = dma.vmem_to_smem %s11_s17, 16, %s60_s19, [#allocation2] }
   0xc   :  { %58 = dma.done.wait [#allocation2], 16 }
   0xd   :  { %59 = vsyncadd [#allocation2], 4294967280 }
   0xe   :  { %15 = sfence }
   0xf   :  { %s19_s20 = sld [smem:[#allocation3]]  ;;  %s43_s21 = sld [smem:[#allocation3 + $0x1]]  ;;  %v18_v0 = vld [vmem:[%s102_s1] sm:$0xff] }
  0x10   :  { %s44_s22 = sld [smem:[#allocation3 + $0x2]] }
  0x15   :  { %v20_v1 = vstv %s19_s20  ;;  %v24_v2 = vstv %s43_s21 }
  0x16   :  { %v21_v3 = vmul.f32 %v20_v1, %v18_v0  ;;  %v25_v4 = vmul.f32 %v24_v2, %v18_v0  ;;  %v28_v5 = vstv %s44_s22 }
  0x17   :  { %v29_v6 = vmul.f32 %v28_v5, %v18_v0 }
  0x18   :  { %22 = vst [vmem:[%s103_s2] sm:$0xff] %v21_v3  ;;  %26 = vst [vmem:[%s104_s3] sm:$0xff] %v25_v4 }
  0x19   :  { %30 = vst [vmem:[%s105_s4] sm:$0xff] %v29_v6 }

</bundles_post_ra>
